<compile_context>
chip_gen: v6e
topology: v6e:2x2x1
jax: 0.10.0
libtpu: 0.0.40
codegen_flags: <defaults>
</compile_context>

<pallas_src>
import jax
import jax.numpy as jnp
from jax.experimental import pallas as pl
from jax.experimental.pallas import tpu as pltpu

KSIZE = 3
BN_EPS = 1e-5
LANE = 128


def _circular_conv(x, w_ref):
    """y[j] = x[(j-2)%L] @ w[0] + x[(j-1)%L] @ w[1] + x[j] @ w[2],  j in [0, L). f32 accum."""
    L = x.shape[0]
    xm1 = jnp.concatenate([x[L - 1:], x[:L - 1]], axis=0)    # row j = x[(j-1) % L]
    xm2 = jnp.concatenate([x[L - 2:], x[:L - 2]], axis=0)    # row j = x[(j-2) % L]
    y = jnp.dot(xm2, w_ref[0], preferred_element_type=jnp.float32)
    y = y + jnp.dot(xm1, w_ref[1], preferred_element_type=jnp.float32)
    y = y + jnp.dot(x, w_ref[2], preferred_element_type=jnp.float32)
    return y                                                 # (L, Cp) f32


def _conv_stats_kernel(x_ref, w_ref, ssum_ref, ssq_ref):
    """Per-batch BN partial sums over the full Lc = L + 2 circular conv output (stats only)."""
    y = _circular_conv(x_ref[...], w_ref)                    # (L, Cp)
    yy = y * y
    # conv rows L, L+1 duplicate rows 0, 1 -> add them once more to cover all Lc rows
    ssum_ref[...] = (jnp.sum(y, axis=0, keepdims=True)
                     + jnp.sum(y[0:2], axis=0, keepdims=True))
    ssq_ref[...] = (jnp.sum(yy, axis=0, keepdims=True)
                    + jnp.sum(yy[0:2], axis=0, keepdims=True))


def _bn_elu_pool_kernel(x_ref, w_ref, ssum_ref, ssq_ref, g_ref, b_ref, o_ref, pbuf_ref):
    """Per-batch: recompute conv, fold BN batch stats to scale/shift, ELU, MaxPool1d(3,2,1)."""
    L, Cp = x_ref.shape
    Lp = o_ref.shape[0]
    nb = ssum_ref.shape[0]
    cnt = float(nb * (L + 2))                                # BN element count / channel (static)

    # --- fold batch statistics into per-channel scale/shift (O(B*Cp), hides under DMA) ---
    mean = jnp.sum(ssum_ref[...], axis=0) / cnt                          # (1, Cp)
    var = jnp.maximum(jnp.sum(ssq_ref[...], axis=0) / cnt - mean * mean, 0.0)
    scale = g_ref[...] * jax.lax.rsqrt(var + BN_EPS)                     # (1, Cp)
    shift = b_ref[...] - mean * scale                                    # (1, Cp)

    # --- recompute conv (cheaper than an HBM y round trip), BN affine, ELU(alpha=1) ---
    y = _circular_conv(x_ref[...], w_ref)                                # (L, Cp) f32
    a = y * scale + shift
    a = jnp.where(a > 0, a, jnp.exp(jnp.minimum(a, 0.0)) - 1.0)

    # --- MaxPool over the length-(L+2) conv output z (z[L]=a[0], z[L+1]=a[1], z[-1]=-inf):
    #     win[p] = max(z[p-1], z[p], z[p+1]);  pool[j] = win[2j]
    neg = jnp.full((1, Cp), -jnp.inf, jnp.float32)
    prev = jnp.concatenate([neg, a[:L - 1]], axis=0)                     # z[p-1]
    nxt = jnp.concatenate([a[1:], a[0:1]], axis=0)                       # z[p+1] (circular)
    win = jnp.maximum(jnp.maximum(prev, a), nxt)                         # (L, Cp)

    pbuf_ref[0:L, :] = win                                               # 8-aligned bulk store
    last = 2 * (Lp - 1)                                                  # last (even) window center
    if last == L:    # static: L even -> win[L] = max(z[L-1], z[L], z[L+1])
        pbuf_ref[L:L + 1, :] = jnp.maximum(jnp.maximum(a[L - 1:L], a[0:1]), a[1:2])
    else:            # static: L odd  -> win[L+1] = max(z[L], z[L+1], -inf pad)
        pbuf_ref[L + 1:L + 2, :] = jnp.maximum(a[0:1], a[1:2])

    o_ref[...] = pbuf_ref[pl.ds(0, Lp, stride=2), :].astype(o_ref.dtype)


def _vmem_limit_bytes():
    """Generation-aware scoped-VMEM limit: ~3/4 of physical, capped (48 MiB v7x, 96 MiB v5e/v6e)."""
    try:
        cap = int(pltpu.get_tpu_info().vmem_capacity_bytes)
    except Exception:
        cap = 64 * 1024 * 1024
    return int(min(3 * cap // 4, 96 * 1024 * 1024))


def conv_layer_forward(x, conv_w, conv_b, bn_gamma, bn_beta, *, mxu_dtype=jnp.float32):
    """x: (B, L, C); conv_w: (C, C, 3) [cout, cin, k]; conv_b/bn_gamma/bn_beta: (C,).

    conv_b is accepted for API parity but unused: training-mode BatchNorm subtracts the batch
    mean directly after the conv, so a per-channel constant cancels exactly.
    mxu_dtype=jnp.bfloat16 gives 2-3x MXU throughput (f32 accumulation kept) but may exceed
    the 1e-4 self-test tolerance; default is f32.
    """
    del conv_b
    B, L, C = x.shape
    Lp = (L + 2 - 1) // 2 + 1                    # MaxPool1d(3, 2, 1) on length L + 2
    Cp = ((C + LANE - 1) // LANE) * LANE         # lane-dense channel dim
    f32 = jnp.float32

    # TODO(synk): for C << 128 a channels-on-sublanes / length-on-lanes layout would avoid
    # storing zero-padded channels in HBM; kept channels-on-lanes since Informer uses C = 512.
    xp = jnp.pad(x.astype(mxu_dtype), ((0, 0), (0, 0), (0, Cp - C)))      # (B, L, Cp)

    w_t = jnp.transpose(conv_w.astype(f32), (2, 1, 0))                    # (k, Cin, Cout)
    w_p = jnp.zeros((KSIZE, Cp, Cp), f32).at[:, :C, :C].set(w_t).astype(mxu_dtype)
    g_p = jnp.zeros((1, Cp), f32).at[0, :C].set(bn_gamma.astype(f32))
    be_p = jnp.zeros((1, Cp), f32).at[0, :C].set(bn_beta.astype(f32))

    cparams = pltpu.CompilerParams(
        dimension_semantics=("parallel",),       # batch axis -> both TCs on v7x
        vmem_limit_bytes=_vmem_limit_bytes(),
    )

    # ---- kernel A: per-batch BN partial sums (stats only; conv result never leaves VMEM) ----
    # TODO(synk): for very long L additionally tile the length axis (grid=(B, L//TL) with a
    # 2-row circular halo) so per-step blocks fit v7x's 64 MiB VMEM and the pipeline has more
    # steps; one full batch element per grid step is ample at these sizes.
    ssum, ssq = pl.pallas_call(
        _conv_stats_kernel,
        grid=(B,),
        in_specs=[
            pl.BlockSpec((None, L, Cp), lambda b: (b, 0, 0)),
            pl.BlockSpec((KSIZE, Cp, Cp), lambda b: (0, 0, 0)),
        ],
        out_specs=(
            pl.BlockSpec((None, 1, Cp), lambda b: (b, 0, 0)),
            pl.BlockSpec((None, 1, Cp), lambda b: (b, 0, 0)),
        ),
        out_shape=(
            jax.ShapeDtypeStruct((B, 1, Cp), f32),
            jax.ShapeDtypeStruct((B, 1, Cp), f32),
        ),
        compiler_params=cparams,
    )(xp, w_p)

    # ---- kernel B: recompute conv + fold BN stats + ELU + maxpool ----
    out_p = pl.pallas_call(
        _bn_elu_pool_kernel,
        grid=(B,),
        in_specs=[
            pl.BlockSpec((None, L, Cp), lambda b: (b, 0, 0)),
            pl.BlockSpec((KSIZE, Cp, Cp), lambda b: (0, 0, 0)),
            pl.BlockSpec((B, 1, Cp), lambda b: (0, 0, 0)),
            pl.BlockSpec((B, 1, Cp), lambda b: (0, 0, 0)),
            pl.BlockSpec((1, Cp), lambda b: (0, 0)),
            pl.BlockSpec((1, Cp), lambda b: (0, 0)),
        ],
        out_specs=pl.BlockSpec((None, Lp, Cp), lambda b: (b, 0, 0)),
        out_shape=jax.ShapeDtypeStruct((B, Lp, Cp), f32),
        scratch_shapes=[pltpu.VMEM((2 * Lp - 1, Cp), f32)],
        compiler_params=cparams,
    )(xp, w_p, ssum, ssq, g_p, be_p)

    return out_p[:, :, :C]


def ref_forward(x, conv_w, conv_b, bn_gamma, bn_beta):
    """Pure-JAX reference of the PyTorch forward (training-mode BatchNorm)."""
    B, L, C = x.shape
    Lc = L + 2
    xp = jnp.concatenate([x[:, -2:, :], x, x[:, :2, :]], axis=1)
    y = conv_b[None, None, :] + sum(
        jnp.einsum('blc,oc->blo', xp[:, k:k + Lc, :], conv_w[:, :, k]) for k in range(KSIZE))
    mean = jnp.mean(y, axis=(0, 1), keepdims=True)
    var = jnp.mean((y - mean) ** 2, axis=(0, 1), keepdims=True)
    yh = (y - mean) / jnp.sqrt(var + BN_EPS) * bn_gamma + bn_beta
    act = jnp.where(yh > 0, yh, jnp.exp(jnp.minimum(yh, 0.0)) - 1.0)
    Lp = (Lc - 1) // 2 + 1
    ap = jnp.pad(act, ((0, 0), (1, 2), (0, 0)), constant_values=-jnp.inf)
    w0 = ap[:, 0:2 * Lp:2]
    w1 = ap[:, 1:2 * Lp + 1:2]
    w2 = ap[:, 2:2 * Lp + 2:2]
    return jnp.maximum(jnp.maximum(w0, w1), w2)


if __name__ == "__main__":
    key = jax.random.PRNGKey(0)
    B, L, C = 2, 16, 8
    k1, k2, k3, k4, k5 = jax.random.split(key, 5)

    x = jax.random.normal(k1, (B, L, C), dtype=jnp.float32)

    # deterministic parameter init (shapes from nn.Conv1d(C, C, 3) / nn.BatchNorm1d(C))
    fan_in = C * KSIZE
    bound = 1.0 / (fan_in ** 0.5)
    conv_w = jax.random.uniform(k2, (C, C, KSIZE), minval=-bound, maxval=bound,
                                dtype=jnp.float32)
    conv_b = jax.random.uniform(k3, (C,), minval=-bound, maxval=bound, dtype=jnp.float32)
    bn_gamma = 1.0 + 0.1 * jax.random.normal(k4, (C,), dtype=jnp.float32)
    bn_beta = 0.1 * jax.random.normal(k5, (C,), dtype=jnp.float32)

    fwd = jax.jit(conv_layer_forward)
    out = fwd(x, conv_w, conv_b, bn_gamma, bn_beta)
    out = jax.block_until_ready(out)

    ref = ref_forward(x, conv_w, conv_b, bn_gamma, bn_beta)
    assert out.shape == (B, (L + 2 - 1) // 2 + 1, C), out.shape
    assert jnp.allclose(out, ref, atol=1e-4, rtol=1e-4), float(jnp.max(jnp.abs(out - ref)))
    print("KERNEL_OK")
</pallas_src>

<mosaic_0001>
module attributes {stable_mosaic.version = 11 : i64} {
  func.func @_conv_stats_kernel(%arg0: i32, %arg1: memref<1x16x128xf32, #tpu.memory_space<vmem>>, %arg2: memref<3x128x128xf32, #tpu.memory_space<vmem>>, %arg3: memref<1x1x128xf32, #tpu.memory_space<vmem>>, %arg4: memref<1x1x128xf32, #tpu.memory_space<vmem>>) attributes {dimension_semantics = [#tpu.dimension_semantics<parallel>], iteration_bounds = array<i64: 2>, scalar_prefetch = 0 : i64, scratch_operands = 0 : i64, tpu.core_type = #tpu.core_type<tc>, window_params = [{transform_indices = @transform_0, window_bounds = array<i64: 1, 16, 128>}, {pipeline_mode = #tpu.pipeline_mode<synchronous>, transform_indices = @transform_1, window_bounds = array<i64: 3, 128, 128>}, {transform_indices = @transform_2, window_bounds = array<i64: 1, 1, 128>}, {transform_indices = @transform_3, window_bounds = array<i64: 1, 1, 128>}]} {
    %c0 = arith.constant 0 : index
    %c0_0 = arith.constant 0 : index
    %c0_1 = arith.constant 0 : index
    %0 = vector.load %arg1[%c0, %c0_0, %c0_1] : memref<1x16x128xf32, #tpu.memory_space<vmem>>, vector<1x16x128xf32>
    %1 = vector.shape_cast %0 : vector<1x16x128xf32> to vector<16x128xf32>
    %2 = vector.extract_strided_slice %1 {offsets = [15, 0], sizes = [1, 128], strides = [1, 1]} : vector<16x128xf32> to vector<1x128xf32>
    %3 = vector.extract_strided_slice %1 {offsets = [0, 0], sizes = [15, 128], strides = [1, 1]} : vector<16x128xf32> to vector<15x128xf32>
    %4 = tpu.concatenate %2, %3 in 0 : vector<1x128xf32>, vector<15x128xf32> -> vector<16x128xf32>
    %5 = vector.extract_strided_slice %1 {offsets = [14, 0], sizes = [2, 128], strides = [1, 1]} : vector<16x128xf32> to vector<2x128xf32>
    %6 = vector.extract_strided_slice %1 {offsets = [0, 0], sizes = [14, 128], strides = [1, 1]} : vector<16x128xf32> to vector<14x128xf32>
    %7 = tpu.concatenate %5, %6 in 0 : vector<2x128xf32>, vector<14x128xf32> -> vector<16x128xf32>
    %c0_2 = arith.constant 0 : index
    %c0_3 = arith.constant 0 : index
    %c0_4 = arith.constant 0 : index
    %8 = vector.load %arg2[%c0_2, %c0_3, %c0_4] : memref<3x128x128xf32, #tpu.memory_space<vmem>>, vector<1x128x128xf32>
    %9 = vector.shape_cast %8 : vector<1x128x128xf32> to vector<128x128xf32>
    %cst = arith.constant dense<0.000000e+00> : vector<16x128xf32>
    %10 = tpu.matmul %7, %9, %cst {dimension_numbers = #tpu.dot_dimension_numbers<[1], [0], [0], [1], [0, 0, 1, 1], [], []>} : vector<16x128xf32>, vector<128x128xf32>, vector<16x128xf32> -> vector<16x128xf32>
    %c1 = arith.constant 1 : index
    %c0_5 = arith.constant 0 : index
    %c0_6 = arith.constant 0 : index
    %11 = vector.load %arg2[%c1, %c0_5, %c0_6] : memref<3x128x128xf32, #tpu.memory_space<vmem>>, vector<1x128x128xf32>
    %12 = vector.shape_cast %11 : vector<1x128x128xf32> to vector<128x128xf32>
    %cst_7 = arith.constant dense<0.000000e+00> : vector<16x128xf32>
    %13 = tpu.matmul %4, %12, %cst_7 {dimension_numbers = #tpu.dot_dimension_numbers<[1], [0], [0], [1], [0, 0, 1, 1], [], []>} : vector<16x128xf32>, vector<128x128xf32>, vector<16x128xf32> -> vector<16x128xf32>
    %14 = arith.addf %10, %13 : vector<16x128xf32>
    %c2 = arith.constant 2 : index
    %c0_8 = arith.constant 0 : index
    %c0_9 = arith.constant 0 : index
    %15 = vector.load %arg2[%c2, %c0_8, %c0_9] : memref<3x128x128xf32, #tpu.memory_space<vmem>>, vector<1x128x128xf32>
    %16 = vector.shape_cast %15 : vector<1x128x128xf32> to vector<128x128xf32>
    %cst_10 = arith.constant dense<0.000000e+00> : vector<16x128xf32>
    %17 = tpu.matmul %1, %16, %cst_10 {dimension_numbers = #tpu.dot_dimension_numbers<[1], [0], [0], [1], [0, 0, 1, 1], [], []>} : vector<16x128xf32>, vector<128x128xf32>, vector<16x128xf32> -> vector<16x128xf32>
    %18 = arith.addf %14, %17 : vector<16x128xf32>
    %19 = arith.mulf %18, %18 : vector<16x128xf32>
    %cst_11 = arith.constant dense<0.000000e+00> : vector<128xf32>
    %20 = vector.multi_reduction <add>, %18, %cst_11 [0] : vector<16x128xf32> to vector<128xf32>
    %21 = vector.shape_cast %20 : vector<128xf32> to vector<1x128xf32>
    %22 = vector.extract_strided_slice %18 {offsets = [0, 0], sizes = [2, 128], strides = [1, 1]} : vector<16x128xf32> to vector<2x128xf32>
    %cst_12 = arith.constant dense<0.000000e+00> : vector<128xf32>
    %23 = vector.multi_reduction <add>, %22, %cst_12 [0] : vector<2x128xf32> to vector<128xf32>
    %24 = vector.shape_cast %23 : vector<128xf32> to vector<1x128xf32>
    %25 = arith.addf %21, %24 : vector<1x128xf32>
    %c0_13 = arith.constant 0 : index
    %c0_14 = arith.constant 0 : index
    %c0_15 = arith.constant 0 : index
    %26 = vector.load %arg3[%c0_13, %c0_14, %c0_15] : memref<1x1x128xf32, #tpu.memory_space<vmem>>, vector<1x1x128xf32>
    %27 = vector.shape_cast %26 : vector<1x1x128xf32> to vector<1x128xf32>
    %28 = vector.shape_cast %25 : vector<1x128xf32> to vector<1x1x128xf32>
    tpu.vector_store %arg3[%c0_13, %c0_14, %c0_15], %28 {strides = array<i32>} : memref<1x1x128xf32, #tpu.memory_space<vmem>>, vector<1x1x128xf32>,
    %cst_16 = arith.constant dense<0.000000e+00> : vector<128xf32>
    %29 = vector.multi_reduction <add>, %19, %cst_16 [0] : vector<16x128xf32> to vector<128xf32>
    %30 = vector.shape_cast %29 : vector<128xf32> to vector<1x128xf32>
    %31 = vector.extract_strided_slice %19 {offsets = [0, 0], sizes = [2, 128], strides = [1, 1]} : vector<16x128xf32> to vector<2x128xf32>
    %cst_17 = arith.constant dense<0.000000e+00> : vector<128xf32>
    %32 = vector.multi_reduction <add>, %31, %cst_17 [0] : vector<2x128xf32> to vector<128xf32>
    %33 = vector.shape_cast %32 : vector<128xf32> to vector<1x128xf32>
    %34 = arith.addf %30, %33 : vector<1x128xf32>
    %c0_18 = arith.constant 0 : index
    %c0_19 = arith.constant 0 : index
    %c0_20 = arith.constant 0 : index
    %35 = vector.load %arg4[%c0_18, %c0_19, %c0_20] : memref<1x1x128xf32, #tpu.memory_space<vmem>>, vector<1x1x128xf32>
    %36 = vector.shape_cast %35 : vector<1x1x128xf32> to vector<1x128xf32>
    %37 = vector.shape_cast %34 : vector<1x128xf32> to vector<1x1x128xf32>
    tpu.vector_store %arg4[%c0_18, %c0_19, %c0_20], %37 {strides = array<i32>} : memref<1x1x128xf32, #tpu.memory_space<vmem>>, vector<1x1x128xf32>,
    return
  }
  func.func @transform_0(%arg0: i32) -> (i32, i32, i32) {
    %c0_i32 = arith.constant 0 : i32
    %c0_i32_0 = arith.constant 0 : i32
    %c0_i32_1 = arith.constant 0 : i32
    return %arg0, %c0_i32, %c0_i32_0 : i32, i32, i32
  }
  func.func @transform_1(%arg0: i32) -> (i32, i32, i32) {
    %c0_i32 = arith.constant 0 : i32
    %c0_i32_0 = arith.constant 0 : i32
    %c0_i32_1 = arith.constant 0 : i32
    %c0_i32_2 = arith.constant 0 : i32
    return %c0_i32, %c0_i32_0, %c0_i32_1 : i32, i32, i32
  }
  func.func @transform_2(%arg0: i32) -> (i32, i32, i32) {
    %c0_i32 = arith.constant 0 : i32
    %c0_i32_0 = arith.constant 0 : i32
    %c0_i32_1 = arith.constant 0 : i32
    return %arg0, %c0_i32, %c0_i32_0 : i32, i32, i32
  }
  func.func @transform_3(%arg0: i32) -> (i32, i32, i32) {
    %c0_i32 = arith.constant 0 : i32
    %c0_i32_0 = arith.constant 0 : i32
    %c0_i32_1 = arith.constant 0 : i32
    return %arg0, %c0_i32, %c0_i32_0 : i32, i32, i32
  }
}

module attributes {stable_mosaic.version = 11 : i64} {
  func.func @_bn_elu_pool_kernel(%arg0: i32, %arg1: memref<1x16x128xf32, #tpu.memory_space<vmem>>, %arg2: memref<3x128x128xf32, #tpu.memory_space<vmem>>, %arg3: memref<2x1x128xf32, #tpu.memory_space<vmem>>, %arg4: memref<2x1x128xf32, #tpu.memory_space<vmem>>, %arg5: memref<1x128xf32, #tpu.memory_space<vmem>>, %arg6: memref<1x128xf32, #tpu.memory_space<vmem>>, %arg7: memref<1x9x128xf32, #tpu.memory_space<vmem>>, %arg8: memref<17x128xf32, #tpu.memory_space<vmem>>) attributes {dimension_semantics = [#tpu.dimension_semantics<parallel>], iteration_bounds = array<i64: 2>, scalar_prefetch = 0 : i64, scratch_operands = 1 : i64, tpu.core_type = #tpu.core_type<tc>, window_params = [{transform_indices = @transform_0, window_bounds = array<i64: 1, 16, 128>}, {pipeline_mode = #tpu.pipeline_mode<synchronous>, transform_indices = @transform_1, window_bounds = array<i64: 3, 128, 128>}, {pipeline_mode = #tpu.pipeline_mode<synchronous>, transform_indices = @transform_2, window_bounds = array<i64: 2, 1, 128>}, {pipeline_mode = #tpu.pipeline_mode<synchronous>, transform_indices = @transform_3, window_bounds = array<i64: 2, 1, 128>}, {pipeline_mode = #tpu.pipeline_mode<synchronous>, transform_indices = @transform_4, window_bounds = array<i64: 1, 128>}, {pipeline_mode = #tpu.pipeline_mode<synchronous>, transform_indices = @transform_5, window_bounds = array<i64: 1, 128>}, {transform_indices = @transform_6, window_bounds = array<i64: 1, 9, 128>}]} {
    %c0 = arith.constant 0 : index
    %c0_0 = arith.constant 0 : index
    %c0_1 = arith.constant 0 : index
    %0 = vector.load %arg3[%c0, %c0_0, %c0_1] : memref<2x1x128xf32, #tpu.memory_space<vmem>>, vector<2x1x128xf32>
    %cst = arith.constant dense<0.000000e+00> : vector<1x128xf32>
    %1 = vector.multi_reduction <add>, %0, %cst [0] : vector<2x1x128xf32> to vector<1x128xf32>
    %cst_2 = arith.constant 3.600000e+01 : f32
    %2 = vector.broadcast %cst_2 : f32 to vector<1x128xf32>
    %3 = arith.divf %1, %2 : vector<1x128xf32>
    %c0_3 = arith.constant 0 : index
    %c0_4 = arith.constant 0 : index
    %c0_5 = arith.constant 0 : index
    %4 = vector.load %arg4[%c0_3, %c0_4, %c0_5] : memref<2x1x128xf32, #tpu.memory_space<vmem>>, vector<2x1x128xf32>
    %cst_6 = arith.constant dense<0.000000e+00> : vector<1x128xf32>
    %5 = vector.multi_reduction <add>, %4, %cst_6 [0] : vector<2x1x128xf32> to vector<1x128xf32>
    %cst_7 = arith.constant 3.600000e+01 : f32
    %6 = vector.broadcast %cst_7 : f32 to vector<1x128xf32>
    %7 = arith.divf %5, %6 : vector<1x128xf32>
    %8 = arith.mulf %3, %3 : vector<1x128xf32>
    %9 = arith.subf %7, %8 : vector<1x128xf32>
    %cst_8 = arith.constant 0.000000e+00 : f32
    %10 = vector.broadcast %cst_8 : f32 to vector<1x128xf32>
    %11 = arith.maximumf %9, %10 : vector<1x128xf32>
    %c0_9 = arith.constant 0 : index
    %c0_10 = arith.constant 0 : index
    %12 = vector.load %arg5[%c0_9, %c0_10] : memref<1x128xf32, #tpu.memory_space<vmem>>, vector<1x128xf32>
    %cst_11 = arith.constant 9.99999974E-6 : f32
    %13 = vector.broadcast %cst_11 : f32 to vector<1x128xf32>
    %14 = arith.addf %11, %13 : vector<1x128xf32>
    %15 = math.rsqrt %14 : vector<1x128xf32>
    %16 = arith.mulf %12, %15 : vector<1x128xf32>
    %c0_12 = arith.constant 0 : index
    %c0_13 = arith.constant 0 : index
    %17 = vector.load %arg6[%c0_12, %c0_13] : memref<1x128xf32, #tpu.memory_space<vmem>>, vector<1x128xf32>
    %18 = arith.mulf %3, %16 : vector<1x128xf32>
    %19 = arith.subf %17, %18 : vector<1x128xf32>
    %c0_14 = arith.constant 0 : index
    %c0_15 = arith.constant 0 : index
    %c0_16 = arith.constant 0 : index
    %20 = vector.load %arg1[%c0_14, %c0_15, %c0_16] : memref<1x16x128xf32, #tpu.memory_space<vmem>>, vector<1x16x128xf32>
    %21 = vector.shape_cast %20 : vector<1x16x128xf32> to vector<16x128xf32>
    %22 = vector.extract_strided_slice %21 {offsets = [15, 0], sizes = [1, 128], strides = [1, 1]} : vector<16x128xf32> to vector<1x128xf32>
    %23 = vector.extract_strided_slice %21 {offsets = [0, 0], sizes = [15, 128], strides = [1, 1]} : vector<16x128xf32> to vector<15x128xf32>
    %24 = tpu.concatenate %22, %23 in 0 : vector<1x128xf32>, vector<15x128xf32> -> vector<16x128xf32>
    %25 = vector.extract_strided_slice %21 {offsets = [14, 0], sizes = [2, 128], strides = [1, 1]} : vector<16x128xf32> to vector<2x128xf32>
    %26 = vector.extract_strided_slice %21 {offsets = [0, 0], sizes = [14, 128], strides = [1, 1]} : vector<16x128xf32> to vector<14x128xf32>
    %27 = tpu.concatenate %25, %26 in 0 : vector<2x128xf32>, vector<14x128xf32> -> vector<16x128xf32>
    %c0_17 = arith.constant 0 : index
    %c0_18 = arith.constant 0 : index
    %c0_19 = arith.constant 0 : index
    %28 = vector.load %arg2[%c0_17, %c0_18, %c0_19] : memref<3x128x128xf32, #tpu.memory_space<vmem>>, vector<1x128x128xf32>
    %29 = vector.shape_cast %28 : vector<1x128x128xf32> to vector<128x128xf32>
    %cst_20 = arith.constant dense<0.000000e+00> : vector<16x128xf32>
    %30 = tpu.matmul %27, %29, %cst_20 {dimension_numbers = #tpu.dot_dimension_numbers<[1], [0], [0], [1], [0, 0, 1, 1], [], []>} : vector<16x128xf32>, vector<128x128xf32>, vector<16x128xf32> -> vector<16x128xf32>
    %c1 = arith.constant 1 : index
    %c0_21 = arith.constant 0 : index
    %c0_22 = arith.constant 0 : index
    %31 = vector.load %arg2[%c1, %c0_21, %c0_22] : memref<3x128x128xf32, #tpu.memory_space<vmem>>, vector<1x128x128xf32>
    %32 = vector.shape_cast %31 : vector<1x128x128xf32> to vector<128x128xf32>
    %cst_23 = arith.constant dense<0.000000e+00> : vector<16x128xf32>
    %33 = tpu.matmul %24, %32, %cst_23 {dimension_numbers = #tpu.dot_dimension_numbers<[1], [0], [0], [1], [0, 0, 1, 1], [], []>} : vector<16x128xf32>, vector<128x128xf32>, vector<16x128xf32> -> vector<16x128xf32>
    %34 = arith.addf %30, %33 : vector<16x128xf32>
    %c2 = arith.constant 2 : index
    %c0_24 = arith.constant 0 : index
    %c0_25 = arith.constant 0 : index
    %35 = vector.load %arg2[%c2, %c0_24, %c0_25] : memref<3x128x128xf32, #tpu.memory_space<vmem>>, vector<1x128x128xf32>
    %36 = vector.shape_cast %35 : vector<1x128x128xf32> to vector<128x128xf32>
    %cst_26 = arith.constant dense<0.000000e+00> : vector<16x128xf32>
    %37 = tpu.matmul %21, %36, %cst_26 {dimension_numbers = #tpu.dot_dimension_numbers<[1], [0], [0], [1], [0, 0, 1, 1], [], []>} : vector<16x128xf32>, vector<128x128xf32>, vector<16x128xf32> -> vector<16x128xf32>
    %38 = arith.addf %34, %37 : vector<16x128xf32>
    %39 = vector.broadcast %16 : vector<1x128xf32> to vector<16x128xf32>
    %40 = arith.mulf %38, %39 : vector<16x128xf32>
    %41 = vector.broadcast %19 : vector<1x128xf32> to vector<16x128xf32>
    %42 = arith.addf %40, %41 : vector<16x128xf32>
    %cst_27 = arith.constant 0.000000e+00 : f32
    %43 = vector.broadcast %cst_27 : f32 to vector<16x128xf32>
    %44 = arith.cmpf ogt, %42, %43 : vector<16x128xf32>
    %cst_28 = arith.constant 0.000000e+00 : f32
    %45 = vector.broadcast %cst_28 : f32 to vector<16x128xf32>
    %46 = arith.minimumf %42, %45 : vector<16x128xf32>
    %47 = math.exp %46 : vector<16x128xf32>
    %cst_29 = arith.constant 1.000000e+00 : f32
    %48 = vector.broadcast %cst_29 : f32 to vector<16x128xf32>
    %49 = arith.subf %47, %48 : vector<16x128xf32>
    %50 = arith.select %44, %42, %49 : vector<16x128xi1>, vector<16x128xf32>
    %cst_30 = arith.constant 0xFF800000 : f32
    %51 = vector.broadcast %cst_30 : f32 to vector<1x128xf32>
    %52 = vector.extract_strided_slice %50 {offsets = [0, 0], sizes = [15, 128], strides = [1, 1]} : vector<16x128xf32> to vector<15x128xf32>
    %53 = tpu.concatenate %51, %52 in 0 : vector<1x128xf32>, vector<15x128xf32> -> vector<16x128xf32>
    %54 = vector.extract_strided_slice %50 {offsets = [1, 0], sizes = [15, 128], strides = [1, 1]} : vector<16x128xf32> to vector<15x128xf32>
    %55 = vector.extract_strided_slice %50 {offsets = [0, 0], sizes = [1, 128], strides = [1, 1]} : vector<16x128xf32> to vector<1x128xf32>
    %56 = tpu.concatenate %54, %55 in 0 : vector<15x128xf32>, vector<1x128xf32> -> vector<16x128xf32>
    %57 = arith.maximumf %53, %50 : vector<16x128xf32>
    %58 = arith.maximumf %57, %56 : vector<16x128xf32>
    %c0_31 = arith.constant 0 : index
    %c0_32 = arith.constant 0 : index
    %59 = vector.load %arg8[%c0_31, %c0_32] : memref<17x128xf32, #tpu.memory_space<vmem>>, vector<16x128xf32>
    tpu.vector_store %arg8[%c0_31, %c0_32], %58 {strides = array<i32>} : memref<17x128xf32, #tpu.memory_space<vmem>>, vector<16x128xf32>,
    %60 = vector.extract_strided_slice %50 {offsets = [15, 0], sizes = [1, 128], strides = [1, 1]} : vector<16x128xf32> to vector<1x128xf32>
    %61 = vector.extract_strided_slice %50 {offsets = [0, 0], sizes = [1, 128], strides = [1, 1]} : vector<16x128xf32> to vector<1x128xf32>
    %62 = arith.maximumf %60, %61 : vector<1x128xf32>
    %63 = vector.extract_strided_slice %50 {offsets = [1, 0], sizes = [1, 128], strides = [1, 1]} : vector<16x128xf32> to vector<1x128xf32>
    %64 = arith.maximumf %62, %63 : vector<1x128xf32>
    %c16 = arith.constant 16 : index
    %c0_33 = arith.constant 0 : index
    %65 = vector.load %arg8[%c16, %c0_33] : memref<17x128xf32, #tpu.memory_space<vmem>>, vector<1x128xf32>
    tpu.vector_store %arg8[%c16, %c0_33], %64 {strides = array<i32>} : memref<17x128xf32, #tpu.memory_space<vmem>>, vector<1x128xf32>,
    %c0_34 = arith.constant 0 : index
    %c0_35 = arith.constant 0 : index
    %66 = tpu.strided_load %arg8[%c0_34, %c0_35] {strides = array<i32: 2, 1>} : memref<17x128xf32, #tpu.memory_space<vmem>>, vector<9x128xf32>
    %c0_36 = arith.constant 0 : index
    %c0_37 = arith.constant 0 : index
    %c0_38 = arith.constant 0 : index
    %67 = vector.load %arg7[%c0_36, %c0_37, %c0_38] : memref<1x9x128xf32, #tpu.memory_space<vmem>>, vector<1x9x128xf32>
    %68 = vector.shape_cast %67 : vector<1x9x128xf32> to vector<9x128xf32>
    %69 = vector.shape_cast %66 : vector<9x128xf32> to vector<1x9x128xf32>
    tpu.vector_store %arg7[%c0_36, %c0_37, %c0_38], %69 {strides = array<i32>} : memref<1x9x128xf32, #tpu.memory_space<vmem>>, vector<1x9x128xf32>,
    return
  }
  func.func @transform_0(%arg0: i32) -> (i32, i32, i32) {
    %c0_i32 = arith.constant 0 : i32
    %c0_i32_0 = arith.constant 0 : i32
    %c0_i32_1 = arith.constant 0 : i32
    return %arg0, %c0_i32, %c0_i32_0 : i32, i32, i32
  }
  func.func @transform_1(%arg0: i32) -> (i32, i32, i32) {
    %c0_i32 = arith.constant 0 : i32
    %c0_i32_0 = arith.constant 0 : i32
    %c0_i32_1 = arith.constant 0 : i32
    %c0_i32_2 = arith.constant 0 : i32
    return %c0_i32, %c0_i32_0, %c0_i32_1 : i32, i32, i32
  }
  func.func @transform_2(%arg0: i32) -> (i32, i32, i32) {
    %c0_i32 = arith.constant 0 : i32
    %c0_i32_0 = arith.constant 0 : i32
    %c0_i32_1 = arith.constant 0 : i32
    %c0_i32_2 = arith.constant 0 : i32
    return %c0_i32, %c0_i32_0, %c0_i32_1 : i32, i32, i32
  }
  func.func @transform_3(%arg0: i32) -> (i32, i32, i32) {
    %c0_i32 = arith.constant 0 : i32
    %c0_i32_0 = arith.constant 0 : i32
    %c0_i32_1 = arith.constant 0 : i32
    %c0_i32_2 = arith.constant 0 : i32
    return %c0_i32, %c0_i32_0, %c0_i32_1 : i32, i32, i32
  }
  func.func @transform_4(%arg0: i32) -> (i32, i32) {
    %c0_i32 = arith.constant 0 : i32
    %c0_i32_0 = arith.constant 0 : i32
    %c0_i32_1 = arith.constant 0 : i32
    return %c0_i32, %c0_i32_0 : i32, i32
  }
  func.func @transform_5(%arg0: i32) -> (i32, i32) {
    %c0_i32 = arith.constant 0 : i32
    %c0_i32_0 = arith.constant 0 : i32
    %c0_i32_1 = arith.constant 0 : i32
    return %c0_i32, %c0_i32_0 : i32, i32
  }
  func.func @transform_6(%arg0: i32) -> (i32, i32, i32) {
    %c0_i32 = arith.constant 0 : i32
    %c0_i32_0 = arith.constant 0 : i32
    %c0_i32_1 = arith.constant 0 : i32
    return %arg0, %c0_i32, %c0_i32_0 : i32, i32, i32
  }
}

</mosaic_0001>

<bundles_post_ra>
// kernel: conv_layer_forward.2
= control target key start
LH: loop header
LB: loop body
LE: loop exit
PB: predicated region body
PF: predicated region fallthrough
CT: control target
= control target key end

     0   :  { %s816_s12 = smov 0   ;;  %s1000_s0 = inlined_call_operand.vmem [shape: f32[2,16,128], index: 0, kind: input, shape index: {}]   ;;  %s1001_s1 = inlined_call_operand.vmem [shape: f32[3,128,128], index: 1, kind: input, shape index: {}]   ;;  %s1002_s2 = inlined_call_operand.vmem [shape: f32[2,1,128], index: 2, kind: output, shape index: {0}]   ;;  %s1003_s3 = inlined_call_operand.vmem [shape: f32[2,1,128], index: 3, kind: output, shape index: {1}]  }
   0x1 LB: > { %s579_s13 = sadd.s32 4294967295, %s794_s12   ;;  %p583_p0 = scmp.ge.s32.totalorder %s794_s12, 1  ;;  %s794_s12 = sphi %s816_s12, %s14_s12  }
   0x2   : > { %p140_p1 = scmp.lt.s32.totalorder %s794_s12, 3 }
   0x4   : > { %p141_p2 = pnand %p583_p0, %p140_p1 }
   0x5   : > { %p165_p3 = scmp.lt.s32.totalorder (!%p141_p2), %s579_s13, 1 }
   0x6   : > { %144 = sbr.rel (%p141_p2) target bundleno = 294 (0x126), region = 28 }
   0xb   : > { %v601_v0 = vld [vmem:[%s1001_s1 + $0xf8] sm:$0xff]  ;;  %v600_v2 = vld [vmem:[%s1001_s1 + $0xf0] sm:$0xff]  ;;  %v599_v4 = vld [vmem:[%s1001_s1 + $0xe8] sm:$0xff]  ;;  %s1005_s13 = smov (!%p165_p3, %s579_s13), 1  ;;  %vm182_vm0 = vcmask 1040384   ;;  %vm190_vm1 = vcmask 1041408  }
   0xc   : > { %v211_v1 = vld [vmem:[%s1001_s1 + $0x78] sm:$0xff]  ;;  %675 = vmatprep.subr.mxu0 %v601_v0  ;;  %v210_v3 = vld [vmem:[%s1001_s1 + $0x70] sm:$0xff]  ;;  %v209_v5 = vld [vmem:[%s1001_s1 + $0x68] sm:$0xff]  ;;  %s620_s29 = sshll.u32 %s1005_s13, 4  ;;  %s172_s16 = scalar_lea.vmem %s1002_s2, %s1005_s13 }
   0xd   : > { %710 = vmatprep.subr.mxu1 %v211_v1  ;;  %676 = vmatpush3.msra.mxu0 %v601_v0  ;;  %v598_v6 = vld [vmem:[%s1001_s1 + $0xe0] sm:$0xff]  ;;  %v597_v8 = vld [vmem:[%s1001_s1 + $0xd8] sm:$0xff]  ;;  %v596_v10 = vld [vmem:[%s1001_s1 + $0xd0] sm:$0xff]  ;;  %s169_s9 = scalar_lea.vmem %s1000_s0, %s620_s29  ;;  %s175_s19 = scalar_lea.vmem %s1003_s3, %s1005_s13 }
   0xe   : > { %711 = vmatpush3.msra.mxu1 %v211_v1  ;;  %677 = vmatprep.subr.mxu0 %v600_v2  ;;  %v208_v7 = vld [vmem:[%s1001_s1 + $0x60] sm:$0xff]  ;;  %v207_v9 = vld [vmem:[%s1001_s1 + $0x58] sm:$0xff]  ;;  %v206_v11 = vld [vmem:[%s1001_s1 + $0x50] sm:$0xff] }
   0xf   : > { %712 = vmatprep.subr.mxu1 %v210_v3  ;;  %678 = vmatpush3.msra.mxu0 %v600_v2  ;;  %v595_v12 = vld [vmem:[%s1001_s1 + $0xc8] sm:$0xff]  ;;  %v594_v14 = vld [vmem:[%s1001_s1 + $0xc0] sm:$0xff]  ;;  %v593_v16 = vld [vmem:[%s1001_s1 + $0xb8] sm:$0xff] }
  0x10   : > { %713 = vmatpush3.msra.mxu1 %v210_v3  ;;  %679 = vmatprep.subr.mxu0 %v599_v4  ;;  %v205_v13 = vld [vmem:[%s1001_s1 + $0x48] sm:$0xff]  ;;  %v204_v15 = vld [vmem:[%s1001_s1 + $0x40] sm:$0xff]  ;;  %v203_v17 = vld [vmem:[%s1001_s1 + $0x38] sm:$0xff] }
  0x11   : > { %714 = vmatprep.subr.mxu1 %v209_v5  ;;  %680 = vmatpush3.msra.mxu0 %v599_v4  ;;  %v592_v18 = vld [vmem:[%s1001_s1 + $0xb0] sm:$0xff]  ;;  %v591_v20 = vld [vmem:[%s1001_s1 + $0xa8] sm:$0xff]  ;;  %v590_v22 = vld [vmem:[%s1001_s1 + $0xa0] sm:$0xff] }
  0x12   : > { %715 = vmatpush3.msra.mxu1 %v209_v5  ;;  %681 = vmatprep.subr.mxu0 %v598_v6  ;;  %v202_v19 = vld [vmem:[%s1001_s1 + $0x30] sm:$0xff]  ;;  %v201_v21 = vld [vmem:[%s1001_s1 + $0x28] sm:$0xff]  ;;  %v200_v23 = vld [vmem:[%s1001_s1 + $0x20] sm:$0xff] }
  0x13   : > { %716 = vmatprep.subr.mxu1 %v208_v7  ;;  %682 = vmatpush3.msra.mxu0 %v598_v6  ;;  %v589_v24 = vld [vmem:[%s1001_s1 + $0x98] sm:$0xff]  ;;  %v176_v26 = vld [vmem:[%s169_s9] sm:$0xff]  ;;  %v912_v27 = vld [vmem:[%s169_s9 + $0x8] sm:$0xff] }
  0x14   : > { %717 = vmatpush3.msra.mxu1 %v208_v7  ;;  %683 = vmatprep.subr.mxu0 %v597_v8  ;;  %v199_v25 = vld [vmem:[%s1001_s1 + $0x18] sm:$0xff]  ;;  %v588_v28 = vld [vmem:[%s1001_s1 + $0x90] sm:$0xff]  ;;  %v179_v30 = vrot.slane %v912_v27, 7  ;;  %v183_v31 = vrot.slane %v176_v26, 7  ;;  %v587_v32 = vld [vmem:[%s1001_s1 + $0x88] sm:$0xff]  ;;  %v188_v34 = vrot.slane %v912_v27, 6 }
  0x15   : > { %718 = vmatprep.subr.mxu1 %v207_v9  ;;  %684 = vmatpush3.msra.mxu0 %v597_v8  ;;  %v198_v29 = vld [vmem:[%s1001_s1 + $0x10] sm:$0xff]  ;;  %v197_v33 = vld [vmem:[%s1001_s1 + $0x8] sm:$0xff]  ;;  %v191_v35 = vrot.slane %v176_v26, 6  ;;  %v586_v36 = vld [vmem:[%s1001_s1 + $0x80] sm:$0xff] }
  0x16   : > { %719 = vmatpush3.msra.mxu1 %v207_v9  ;;  %685 = vmatprep.subr.mxu0 %v596_v10  ;;  %v196_v37 = vld [vmem:[%s1001_s1] sm:$0xff]  ;;  %v187_v38 = vsel %vm182_vm0, %v179_v30, %v183_v31  ;;  %v184_v40 = vsel %vm182_vm0, %v183_v31, %v179_v30  ;;  %v617_v42 = vld [vmem:[%s1001_s1 + $0x178] sm:$0xff]  ;;  %v616_v43 = vld [vmem:[%s1001_s1 + $0x170] sm:$0xff] }
  0x17   : > { %720 = vmatprep.subr.mxu1 %v206_v11  ;;  %686 = vmatpush3.msra.mxu0 %v596_v10  ;;  %v195_v39 = vsel %vm190_vm1, %v188_v34, %v191_v35  ;;  %v192_v41 = vsel %vm190_vm1, %v191_v35, %v188_v34  ;;  %v615_v44 = vld [vmem:[%s1001_s1 + $0x168] sm:$0xff]  ;;  %v614_v45 = vld [vmem:[%s1001_s1 + $0x160] sm:$0xff]  ;;  %v613_v46 = vld [vmem:[%s1001_s1 + $0x158] sm:$0xff] }
  0x18   : > { %721 = vmatpush3.msra.mxu1 %v206_v11  ;;  %687 = vmatprep.subr.mxu0 %v595_v12  ;;  %v612_v47 = vld [vmem:[%s1001_s1 + $0x150] sm:$0xff]  ;;  %v611_v48 = vld [vmem:[%s1001_s1 + $0x148] sm:$0xff]  ;;  %v610_v49 = vld [vmem:[%s1001_s1 + $0x140] sm:$0xff] }
  0x19   : > { %722 = vmatprep.subr.mxu1 %v205_v13  ;;  %688 = vmatpush3.msra.mxu0 %v595_v12  ;;  %v609_v50 = vld [vmem:[%s1001_s1 + $0x138] sm:$0xff]  ;;  %v608_v51 = vld [vmem:[%s1001_s1 + $0x130] sm:$0xff]  ;;  %v607_v52 = vld [vmem:[%s1001_s1 + $0x128] sm:$0xff] }
  0x1a   : > { %723 = vmatpush3.msra.mxu1 %v205_v13  ;;  %689 = vmatprep.subr.mxu0 %v594_v14  ;;  %v606_v53 = vld [vmem:[%s1001_s1 + $0x120] sm:$0xff]  ;;  %v605_v54 = vld [vmem:[%s1001_s1 + $0x118] sm:$0xff]  ;;  %v604_v55 = vld [vmem:[%s1001_s1 + $0x110] sm:$0xff] }
  0x1b   : > { %724 = vmatprep.subr.mxu1 %v204_v15  ;;  %690 = vmatpush3.msra.mxu0 %v594_v14  ;;  %v603_v56 = vld [vmem:[%s1001_s1 + $0x108] sm:$0xff]  ;;  %v602_v57 = vld [vmem:[%s1001_s1 + $0x100] sm:$0xff] }
  0x1c   : > { %725 = vmatpush3.msra.mxu1 %v204_v15  ;;  %691 = vmatprep.subr.mxu0 %v593_v16 }
  0x1d   : > { %726 = vmatprep.subr.mxu1 %v203_v17  ;;  %692 = vmatpush3.msra.mxu0 %v593_v16 }
  0x1e   : > { %727 = vmatpush3.msra.mxu1 %v203_v17  ;;  %693 = vmatprep.subr.mxu0 %v592_v18 }
  0x1f   : > { %728 = vmatprep.subr.mxu1 %v202_v19  ;;  %694 = vmatpush3.msra.mxu0 %v592_v18 }
  0x20   : > { %729 = vmatpush3.msra.mxu1 %v202_v19  ;;  %695 = vmatprep.subr.mxu0 %v591_v20 }
  0x21   : > { %730 = vmatprep.subr.mxu1 %v201_v21  ;;  %696 = vmatpush3.msra.mxu0 %v591_v20 }
  0x22   : > { %731 = vmatpush3.msra.mxu1 %v201_v21  ;;  %697 = vmatprep.subr.mxu0 %v590_v22 }
  0x23   : > { %732 = vmatprep.subr.mxu1 %v200_v23  ;;  %698 = vmatpush3.msra.mxu0 %v590_v22 }
  0x24   : > { %733 = vmatpush3.msra.mxu1 %v200_v23  ;;  %699 = vmatprep.subr.mxu0 %v589_v24 }
  0x25   : > { %734 = vmatprep.subr.mxu1 %v199_v25  ;;  %700 = vmatpush3.msra.mxu0 %v589_v24 }
  0x26   : > { %735 = vmatpush3.msra.mxu1 %v199_v25  ;;  %701 = vmatprep.subr.mxu0 %v588_v28 }
  0x27   : > { %736 = vmatprep.subr.mxu1 %v198_v29  ;;  %702 = vmatpush3.msra.mxu0 %v588_v28 }
  0x28   : > { %737 = vmatpush3.msra.mxu1 %v198_v29  ;;  %703 = vmatprep.subr.mxu0 %v587_v32 }
  0x29   : > { %738 = vmatprep.subr.mxu1 %v197_v33  ;;  %704 = vmatpush3.msra.mxu0 %v587_v32 }
  0x2a   : > { %739 = vmatpush3.msra.mxu1 %v197_v33  ;;  %705 = vmatprep.subr.mxu0 %v586_v36 }
  0x2b   : > { %740 = vmatprep.subr.mxu1 %v196_v37  ;;  %706 = vmatpush3.msra.mxu0 %v586_v36 }
  0x2c   : > { %707 = vmatprep.mubr.f32.mxu0 %v187_v38  ;;  %741 = vmatpush3.msra.mxu1 %v196_v37 }
  0x2d   : > { %742 = vmatprep.mubr.f32.mxu1 %v195_v39  ;;  %708 = vmatmul.mubr.f32.vlgmr.msra.gmra.mxu0 %v184_v40 }
  0x2e   : > { %743 = vmatmul.mubr.f32.vlgmr.msra.gmra.mxu1 %v192_v41  ;;  %745 = vmatprep.subr.mxu0 %v617_v42 }
  0x2f   : > { %777 = vmatprep.mubr.f32.mxu0 %v176_v26  ;;  %746 = vmatpush3.msra.mxu0 %v617_v42 }
  0x30   : > { %747 = vmatprep.subr.mxu0 %v616_v43 }
  0x31   : > { %748 = vmatpush3.msra.mxu0 %v616_v43 }
  0x32   : > { %749 = vmatprep.subr.mxu0 %v615_v44 }
  0x33   : > { %750 = vmatpush3.msra.mxu0 %v615_v44 }
  0x34   : > { %751 = vmatprep.subr.mxu0 %v614_v45 }
  0x35   : > { %752 = vmatpush3.msra.mxu0 %v614_v45 }
  0x36   : > { %753 = vmatprep.subr.mxu0 %v613_v46 }
  0x37   : > { %754 = vmatpush3.msra.mxu0 %v613_v46 }
  0x38   : > { %755 = vmatprep.subr.mxu0 %v612_v47 }
  0x39   : > { %756 = vmatpush3.msra.mxu0 %v612_v47 }
  0x3a   : > { %757 = vmatprep.subr.mxu0 %v611_v48 }
  0x3b   : > { %758 = vmatpush3.msra.mxu0 %v611_v48 }
  0x3c   : > { %759 = vmatprep.subr.mxu0 %v610_v49 }
  0x3d   : > { %760 = vmatpush3.msra.mxu0 %v610_v49 }
  0x3e   : > { %761 = vmatprep.subr.mxu0 %v609_v50 }
  0x3f   : > { %762 = vmatpush3.msra.mxu0 %v609_v50 }
  0x40   : > { %763 = vmatprep.subr.mxu0 %v608_v51 }
  0x41   : > { %764 = vmatpush3.msra.mxu0 %v608_v51 }
  0x42   : > { %765 = vmatprep.subr.mxu0 %v607_v52 }
  0x43   : > { %766 = vmatpush3.msra.mxu0 %v607_v52 }
  0x44   : > { %767 = vmatprep.subr.mxu0 %v606_v53 }
  0x45   : > { %768 = vmatpush3.msra.mxu0 %v606_v53 }
  0x46   : > { %769 = vmatprep.subr.mxu0 %v605_v54 }
  0x47   : > { %770 = vmatpush3.msra.mxu0 %v605_v54 }
  0x48   : > { %771 = vmatprep.subr.mxu0 %v604_v55 }
  0x49   : > { %772 = vmatpush3.msra.mxu0 %v604_v55 }
  0x4a   : > { %773 = vmatprep.subr.mxu0 %v603_v56 }
  0x4b   : > { %774 = vmatpush3.msra.mxu0 %v603_v56 }
  0x4c   : > { %775 = vmatprep.subr.mxu0 %v602_v57 }
  0x4d   : > { %776 = vmatpush3.msra.mxu0 %v602_v57 }
  0x4e   : > { %778 = vmatmul.mubr.f32.vlgmr.msra.gmra.mxu0 %v912_v27 }
  0xed   : > { %v709_v58 = vpop.f32.mrf.mxu0 }
  0xee   : > { %v744_v59 = vpop.f32.mrf.mxu1 }
  0xef   : > { %v295_v60 = vpop.f32.mrf.mxu0  ;;  %v376_v62 = vadd.f32 %v744_v59, %v709_v58 }
  0xf0   : > { %v370_v61 = vpop.f32.mrf.mxu1 }
  0xf1   : > { %v371_v0 = vadd.f32 %v370_v61, %v295_v60 }
 0x10e   : > { %v779_v63 = vpop.f32.mrf.mxu0 }
 0x10f   : > { %v472_v1 = vadd.f32 %v779_v63, %v376_v62 }
 0x110   : > { %v462_v2 = vpop.f32.mrf.mxu0 }
 0x111   : > { %v471_v3 = vadd.f32 %v462_v2, %v371_v0  ;;  %v474_v4 = vmul.f32 %v472_v1, %v472_v1 }
 0x113   : > { %v473_v5 = vmul.f32 %v471_v3, %v471_v3  ;;  %v475_v6 = vadd.f32 %v472_v1, %v471_v3  ;;  %v482_v7 = vsel %vm190_vm1, %v471_v3, 0.0 }
 0x114   : > { %v483_v8 = vrot.slane %v482_v7, 4 }
 0x115   : > { %v476_v9 = vrot.slane %v475_v6, 4  ;;  %v491_v10 = vadd.f32 %v474_v4, %v473_v5  ;;  %v498_v11 = vsel %vm190_vm1, %v473_v5, 0.0 }
 0x116   : > { %v484_v12 = vadd.f32 %v483_v8, %v482_v7  ;;  %v499_v13 = vrot.slane %v498_v11, 4 }
 0x117   : > { %v477_v14 = vadd.f32 %v476_v9, %v475_v6  ;;  %v492_v15 = vrot.slane %v491_v10, 4 }
 0x118   : > { %v485_v16 = vrot.slane %v484_v12, 2  ;;  %v500_v17 = vadd.f32 %v499_v13, %v498_v11 }
 0x119   : > { %v478_v18 = vrot.slane %v477_v14, 2  ;;  %v493_v19 = vadd.f32 %v492_v15, %v491_v10 }
 0x11a   : > { %v486_v20 = vadd.f32 %v485_v16, %v484_v12  ;;  %v501_v21 = vrot.slane %v500_v17, 2 }
 0x11b   : > { %v479_v22 = vadd.f32 %v478_v18, %v477_v14  ;;  %v494_v23 = vrot.slane %v493_v19, 2 }
 0x11c   : > { %v487_v24 = vrot.slane %v486_v20, 1  ;;  %v502_v25 = vadd.f32 %v501_v21, %v500_v17 }
 0x11d   : > { %v480_v26 = vrot.slane %v479_v22, 1  ;;  %v495_v27 = vadd.f32 %v494_v23, %v493_v19 }
 0x11e   : > { %v488_v28 = vadd.f32 %v487_v24, %v486_v20  ;;  %v503_v29 = vrot.slane %v502_v25, 1 }
 0x11f   : > { %v481_v30 = vadd.f32 %v480_v26, %v479_v22  ;;  %v496_v31 = vrot.slane %v495_v27, 1 }
 0x120   : > { %v504_v32 = vadd.f32 %v503_v29, %v502_v25 }
 0x121   : > { %v489_v33 = vadd.f32 %v488_v28, %v481_v30  ;;  %v497_v34 = vadd.f32 %v496_v31, %v495_v27 }
 0x123   : > { %490 = vst [vmem:[%s172_s16] sm:$0x1] %v489_v33  ;;  %v505_v35 = vadd.f32 %v504_v32, %v497_v34 }
 0x125   : > { %506 = vst [vmem:[%s175_s19] sm:$0x1] %v505_v35 }
 0x126 PF: > { %s14_s12 = sadd.s32 1, %s794_s12  }
 0x127   : > { %p11_p4 = scmp.ge.s32.totalorder %s14_s12, 4  }
 0x129   :  { %13 = sbr.rel (!%p11_p4) target bundleno = 1 (0x1), region = 72 }

// kernel: conv_layer_forward.3
= control target key start
LH: loop header
LB: loop body
LE: loop exit
PB: predicated region body
PF: predicated region fallthrough
CT: control target
= control target key end

     0   :  { %s950_s21 = smov 0   ;;  %s1153_s0 = inlined_call_operand.vmem [shape: f32[2,16,128], index: 0, kind: input, shape index: {}]   ;;  %s1154_s1 = inlined_call_operand.vmem [shape: f32[3,128,128], index: 1, kind: input, shape index: {}]   ;;  %s1155_s2 = inlined_call_operand.vmem [shape: f32[2,1,128], index: 2, kind: input, shape index: {}]   ;;  %s1156_s3 = inlined_call_operand.vmem [shape: f32[2,1,128], index: 3, kind: input, shape index: {}]   ;;  %s1157_s4 = inlined_call_operand.vmem [shape: f32[1,128], index: 4, kind: input, shape index: {}]   ;;  %s1158_s5 = inlined_call_operand.vmem [shape: f32[1,128], index: 5, kind: input, shape index: {}]   ;;  %s1159_s6 = inlined_call_operand.vmem [shape: f32[2,9,128], index: 6, kind: output, shape index: {}]  }
   0x1 LB: > { %s687_s22 = sadd.s32 4294967295, %s913_s21   ;;  %p691_p0 = scmp.ge.s32.totalorder %s913_s21, 1  ;;  %s913_s21 = sphi %s950_s21, %s16_s21  }
   0x2   : > { %p212_p1 = scmp.lt.s32.totalorder %s913_s21, 3 }
   0x4   : > { %p213_p2 = pnand %p691_p0, %p212_p1 }
   0x5   : > { %p242_p3 = scmp.lt.s32.totalorder (!%p213_p2), %s687_s22, 1 }
   0x6   : > { %216 = sbr.rel (%p213_p2) target bundleno = 316 (0x13c), region = 44 }
   0xb   : > { %v711_v0 = vld [vmem:[%s1154_s1 + $0xf8] sm:$0xff]  ;;  %v710_v2 = vld [vmem:[%s1154_s1 + $0xf0] sm:$0xff]  ;;  %v709_v4 = vld [vmem:[%s1154_s1 + $0xe8] sm:$0xff]  ;;  %s1161_s22 = smov (!%p242_p3, %s687_s22), 1  ;;  %vm254_vm0 = vcmask 1040384   ;;  %vm289_vm1 = vcmask 1041408  }
   0xc   : > { %v310_v1 = vld [vmem:[%s1154_s1 + $0x78] sm:$0xff]  ;;  %788 = vmatprep.subr.mxu0 %v711_v0  ;;  %v309_v3 = vld [vmem:[%s1154_s1 + $0x70] sm:$0xff]  ;;  %v308_v5 = vld [vmem:[%s1154_s1 + $0x68] sm:$0xff]  ;;  %s732_s17 = sshll.u32 %s1161_s22, 4  ;;  %vm608_vm4 = vcmask 1046528  }
   0xd   : > { %823 = vmatprep.subr.mxu1 %v310_v1  ;;  %789 = vmatpush3.msra.mxu0 %v711_v0  ;;  %v708_v6 = vld [vmem:[%s1154_s1 + $0xe0] sm:$0xff]  ;;  %v707_v8 = vld [vmem:[%s1154_s1 + $0xd8] sm:$0xff]  ;;  %v706_v10 = vld [vmem:[%s1154_s1 + $0xd0] sm:$0xff]  ;;  %s246_s26 = scalar_lea.vmem %s1153_s0, %s732_s17  ;;  %s251_s30 = scalar_lea.vmem %s1159_s6, %s732_s17 }
   0xe   : > { %824 = vmatpush3.msra.mxu1 %v310_v1  ;;  %790 = vmatprep.subr.mxu0 %v710_v2  ;;  %v307_v7 = vld [vmem:[%s1154_s1 + $0x60] sm:$0xff]  ;;  %v306_v9 = vld [vmem:[%s1154_s1 + $0x58] sm:$0xff]  ;;  %v305_v11 = vld [vmem:[%s1154_s1 + $0x50] sm:$0xff] }
   0xf   : > { %825 = vmatprep.subr.mxu1 %v309_v3  ;;  %791 = vmatpush3.msra.mxu0 %v710_v2  ;;  %v705_v12 = vld [vmem:[%s1154_s1 + $0xc8] sm:$0xff]  ;;  %v704_v14 = vld [vmem:[%s1154_s1 + $0xc0] sm:$0xff]  ;;  %v703_v16 = vld [vmem:[%s1154_s1 + $0xb8] sm:$0xff] }
  0x10   : > { %826 = vmatpush3.msra.mxu1 %v309_v3  ;;  %792 = vmatprep.subr.mxu0 %v709_v4  ;;  %v304_v13 = vld [vmem:[%s1154_s1 + $0x48] sm:$0xff]  ;;  %v303_v15 = vld [vmem:[%s1154_s1 + $0x40] sm:$0xff]  ;;  %v302_v17 = vld [vmem:[%s1154_s1 + $0x38] sm:$0xff] }
  0x11   : > { %827 = vmatprep.subr.mxu1 %v308_v5  ;;  %793 = vmatpush3.msra.mxu0 %v709_v4  ;;  %v702_v18 = vld [vmem:[%s1154_s1 + $0xb0] sm:$0xff]  ;;  %v701_v20 = vld [vmem:[%s1154_s1 + $0xa8] sm:$0xff]  ;;  %v700_v22 = vld [vmem:[%s1154_s1 + $0xa0] sm:$0xff] }
  0x12   : > { %828 = vmatpush3.msra.mxu1 %v308_v5  ;;  %794 = vmatprep.subr.mxu0 %v708_v6  ;;  %v301_v19 = vld [vmem:[%s1154_s1 + $0x30] sm:$0xff]  ;;  %v300_v21 = vld [vmem:[%s1154_s1 + $0x28] sm:$0xff]  ;;  %v299_v23 = vld [vmem:[%s1154_s1 + $0x20] sm:$0xff] }
  0x13   : > { %829 = vmatprep.subr.mxu1 %v307_v7  ;;  %795 = vmatpush3.msra.mxu0 %v708_v6  ;;  %v699_v24 = vld [vmem:[%s1154_s1 + $0x98] sm:$0xff]  ;;  %v276_v26 = vld [vmem:[%s246_s26] sm:$0xff]  ;;  %v1048_v27 = vld [vmem:[%s246_s26 + $0x8] sm:$0xff] }
  0x14   : > { %830 = vmatpush3.msra.mxu1 %v307_v7  ;;  %796 = vmatprep.subr.mxu0 %v707_v8  ;;  %v298_v25 = vld [vmem:[%s1154_s1 + $0x18] sm:$0xff]  ;;  %v698_v28 = vld [vmem:[%s1154_s1 + $0x90] sm:$0xff]  ;;  %v279_v30 = vrot.slane %v1048_v27, 7  ;;  %v282_v31 = vrot.slane %v276_v26, 7  ;;  %v697_v32 = vld [vmem:[%s1154_s1 + $0x88] sm:$0xff]  ;;  %v287_v34 = vrot.slane %v1048_v27, 6 }
  0x15   : > { %831 = vmatprep.subr.mxu1 %v306_v9  ;;  %797 = vmatpush3.msra.mxu0 %v707_v8  ;;  %v297_v29 = vld [vmem:[%s1154_s1 + $0x10] sm:$0xff]  ;;  %v296_v33 = vld [vmem:[%s1154_s1 + $0x8] sm:$0xff]  ;;  %v290_v35 = vrot.slane %v276_v26, 6  ;;  %v696_v36 = vld [vmem:[%s1154_s1 + $0x80] sm:$0xff] }
  0x16   : > { %832 = vmatpush3.msra.mxu1 %v306_v9  ;;  %798 = vmatprep.subr.mxu0 %v706_v10  ;;  %v295_v37 = vld [vmem:[%s1154_s1] sm:$0xff]  ;;  %v286_v38 = vsel %vm254_vm0, %v279_v30, %v282_v31  ;;  %v283_v40 = vsel %vm254_vm0, %v282_v31, %v279_v30  ;;  %v727_v42 = vld [vmem:[%s1154_s1 + $0x178] sm:$0xff]  ;;  %v726_v43 = vld [vmem:[%s1154_s1 + $0x170] sm:$0xff] }
  0x17   : > { %833 = vmatprep.subr.mxu1 %v305_v11  ;;  %799 = vmatpush3.msra.mxu0 %v706_v10  ;;  %v294_v39 = vsel %vm289_vm1, %v287_v34, %v290_v35  ;;  %v291_v41 = vsel %vm289_vm1, %v290_v35, %v287_v34  ;;  %v725_v44 = vld [vmem:[%s1154_s1 + $0x168] sm:$0xff]  ;;  %v724_v45 = vld [vmem:[%s1154_s1 + $0x160] sm:$0xff]  ;;  %v723_v46 = vld [vmem:[%s1154_s1 + $0x158] sm:$0xff] }
  0x18   : > { %834 = vmatpush3.msra.mxu1 %v305_v11  ;;  %800 = vmatprep.subr.mxu0 %v705_v12  ;;  %v722_v47 = vld [vmem:[%s1154_s1 + $0x150] sm:$0xff]  ;;  %v721_v48 = vld [vmem:[%s1154_s1 + $0x148] sm:$0xff]  ;;  %v720_v49 = vld [vmem:[%s1154_s1 + $0x140] sm:$0xff] }
  0x19   : > { %835 = vmatprep.subr.mxu1 %v304_v13  ;;  %801 = vmatpush3.msra.mxu0 %v705_v12  ;;  %v719_v50 = vld [vmem:[%s1154_s1 + $0x138] sm:$0xff]  ;;  %v718_v51 = vld [vmem:[%s1154_s1 + $0x130] sm:$0xff]  ;;  %v717_v52 = vld [vmem:[%s1154_s1 + $0x128] sm:$0xff]  ;;  %v573_v12 = vlaneseq }
  0x1a   : > { %836 = vmatpush3.msra.mxu1 %v304_v13  ;;  %802 = vmatprep.subr.mxu0 %v704_v14  ;;  %v716_v53 = vld [vmem:[%s1154_s1 + $0x120] sm:$0xff]  ;;  %v715_v54 = vld [vmem:[%s1154_s1 + $0x118] sm:$0xff]  ;;  %v714_v55 = vld [vmem:[%s1154_s1 + $0x110] sm:$0xff] }
  0x1b   : > { %837 = vmatprep.subr.mxu1 %v303_v15  ;;  %803 = vmatpush3.msra.mxu0 %v704_v14  ;;  %v713_v56 = vld [vmem:[%s1154_s1 + $0x108] sm:$0xff]  ;;  %v712_v57 = vld [vmem:[%s1154_s1 + $0x100] sm:$0xff]  ;;  %v574_v14 = vshrl.u32 %v573_v12, 7 }
  0x1c   : > { %838 = vmatpush3.msra.mxu1 %v303_v15  ;;  %804 = vmatprep.subr.mxu0 %v703_v16  ;;  %v252_v58 = vld [vmem:[%s1155_s2] sm:$0x1]  ;;  %v253_v59 = vld [vmem:[%s1155_s2 + $0x1] sm:$0x1] }
  0x1d   : > { %839 = vmatprep.subr.mxu1 %v302_v17  ;;  %805 = vmatpush3.msra.mxu0 %v703_v16  ;;  %v255_v60 = vsel %vm254_vm0, %v252_v58, 0.0  ;;  %v256_v61 = vsel %vm254_vm0, %v253_v59, 0.0  ;;  %v260_v62 = vld [vmem:[%s1156_s3] sm:$0x1]  ;;  %v261_v63 = vld [vmem:[%s1156_s3 + $0x1] sm:$0x1] }
  0x1e   : > { %840 = vmatpush3.msra.mxu1 %v302_v17  ;;  %806 = vmatprep.subr.mxu0 %v702_v18  ;;  %v257_v0 = vadd.f32 %v256_v61, %v255_v60  ;;  %v262_v1 = vsel %vm254_vm0, %v260_v62, 0.0  ;;  %v263_v2 = vsel %vm254_vm0, %v261_v63, 0.0  ;;  %v269_v11 = vld [vmem:[%s1157_s4] sm:$0x1] }
  0x1f   : > { %841 = vmatprep.subr.mxu1 %v301_v19  ;;  %807 = vmatpush3.msra.mxu0 %v702_v18  ;;  %v264_v4 = vadd.f32 %v263_v2, %v262_v1  ;;  %v273_v18 = vld [vmem:[%s1158_s5] sm:$0x1] }
  0x20   : > { %842 = vmatpush3.msra.mxu1 %v301_v19  ;;  %808 = vmatprep.subr.mxu0 %v701_v20  ;;  %v259_v3 = vmul.f32 0.027777778, %v257_v0  ;;  %v575_v19 = vsub.s32 0, %v574_v14 }
  0x21   : > { %843 = vmatprep.subr.mxu1 %v300_v21  ;;  %809 = vmatpush3.msra.mxu0 %v701_v20  ;;  %v265_v5 = vmul.f32 0.027777778, %v264_v4 }
  0x22   : > { %844 = vmatpush3.msra.mxu1 %v300_v21  ;;  %810 = vmatprep.subr.mxu0 %v700_v22  ;;  %v266_v6 = vmul.f32 %v259_v3, %v259_v3 }
  0x23   : > { %845 = vmatprep.subr.mxu1 %v299_v23  ;;  %811 = vmatpush3.msra.mxu0 %v700_v22 }
  0x24   : > { %846 = vmatpush3.msra.mxu1 %v299_v23  ;;  %812 = vmatprep.subr.mxu0 %v699_v24  ;;  %v267_v7 = vsub.f32 %v265_v5, %v266_v6 }
  0x25   : > { %847 = vmatprep.subr.mxu1 %v298_v25  ;;  %813 = vmatpush3.msra.mxu0 %v699_v24 }
  0x26   : > { %848 = vmatpush3.msra.mxu1 %v298_v25  ;;  %814 = vmatprep.subr.mxu0 %v698_v28  ;;  %v268_v8 = vmax.f32 %v267_v7, 0.0 }
  0x27   : > { %849 = vmatprep.subr.mxu1 %v297_v29  ;;  %815 = vmatpush3.msra.mxu0 %v698_v28 }
  0x28   : > { %850 = vmatpush3.msra.mxu1 %v297_v29  ;;  %816 = vmatprep.subr.mxu0 %v697_v32  ;;  %v270_v9 = vadd.f32 1e-05, %v268_v8 }
  0x29   : > { %851 = vmatprep.subr.mxu1 %v296_v33  ;;  %817 = vmatpush3.msra.mxu0 %v697_v32 }
  0x2a   : > { %852 = vmatpush3.msra.mxu1 %v296_v33  ;;  %818 = vmatprep.subr.mxu0 %v696_v36  ;;  %901 = vrsqrt.f32 %v270_v9 }
  0x2b   : > { %853 = vmatprep.subr.mxu1 %v295_v37  ;;  %819 = vmatpush3.msra.mxu0 %v696_v36 }
  0x2c   : > { %820 = vmatprep.mubr.f32.mxu0 %v286_v38  ;;  %854 = vmatpush3.msra.mxu1 %v295_v37 }
  0x2d   : > { %855 = vmatprep.mubr.f32.mxu1 %v294_v39  ;;  %821 = vmatmul.mubr.f32.vlgmr.msra.gmra.mxu0 %v283_v40 }
  0x2e   : > { %856 = vmatmul.mubr.f32.vlgmr.msra.gmra.mxu1 %v291_v41  ;;  %858 = vmatprep.subr.mxu0 %v727_v42 }
  0x2f   : > { %890 = vmatprep.mubr.f32.mxu0 %v276_v26  ;;  %859 = vmatpush3.msra.mxu0 %v727_v42 }
  0x30   : > { %860 = vmatprep.subr.mxu0 %v726_v43 }
  0x31   : > { %861 = vmatpush3.msra.mxu0 %v726_v43 }
  0x32   : > { %862 = vmatprep.subr.mxu0 %v725_v44 }
  0x33   : > { %863 = vmatpush3.msra.mxu0 %v725_v44 }
  0x34   : > { %864 = vmatprep.subr.mxu0 %v724_v45 }
  0x35   : > { %865 = vmatpush3.msra.mxu0 %v724_v45 }
  0x36   : > { %866 = vmatprep.subr.mxu0 %v723_v46 }
  0x37   : > { %867 = vmatpush3.msra.mxu0 %v723_v46  ;;  %v902_v10 = vpop.eup %901 }
  0x38   : > { %868 = vmatprep.subr.mxu0 %v722_v47  ;;  %v272_v13 = vmul.f32 %v902_v10, %v269_v11 }
  0x39   : > { %869 = vmatpush3.msra.mxu0 %v722_v47 }
  0x3a   : > { %870 = vmatprep.subr.mxu0 %v721_v48  ;;  %v274_v15 = vmul.f32 %v272_v13, %v259_v3  ;;  %v576_v24 = vrot.slane %v272_v13, %v575_v19 }
  0x3b   : > { %871 = vmatpush3.msra.mxu0 %v721_v48 }
  0x3c   : > { %872 = vmatprep.subr.mxu0 %v720_v49  ;;  %v275_v20 = vsub.f32 %v273_v18, %v274_v15 }
  0x3d   : > { %873 = vmatpush3.msra.mxu0 %v720_v49 }
  0x3e   : > { %874 = vmatprep.subr.mxu0 %v719_v50  ;;  %v584_v28 = vrot.slane %v275_v20, %v575_v19 }
  0x3f   : > { %875 = vmatpush3.msra.mxu0 %v719_v50 }
  0x40   : > { %876 = vmatprep.subr.mxu0 %v718_v51 }
  0x41   : > { %877 = vmatpush3.msra.mxu0 %v718_v51 }
  0x42   : > { %878 = vmatprep.subr.mxu0 %v717_v52 }
  0x43   : > { %879 = vmatpush3.msra.mxu0 %v717_v52 }
  0x44   : > { %880 = vmatprep.subr.mxu0 %v716_v53 }
  0x45   : > { %881 = vmatpush3.msra.mxu0 %v716_v53 }
  0x46   : > { %882 = vmatprep.subr.mxu0 %v715_v54 }
  0x47   : > { %883 = vmatpush3.msra.mxu0 %v715_v54 }
  0x48   : > { %884 = vmatprep.subr.mxu0 %v714_v55 }
  0x49   : > { %885 = vmatpush3.msra.mxu0 %v714_v55 }
  0x4a   : > { %886 = vmatprep.subr.mxu0 %v713_v56 }
  0x4b   : > { %887 = vmatpush3.msra.mxu0 %v713_v56 }
  0x4c   : > { %888 = vmatprep.subr.mxu0 %v712_v57 }
  0x4d   : > { %889 = vmatpush3.msra.mxu0 %v712_v57 }
  0x4e   : > { %891 = vmatmul.mubr.f32.vlgmr.msra.gmra.mxu0 %v1048_v27 }
  0xed   : > { %v822_v16 = vpop.f32.mrf.mxu0 }
  0xee   : > { %v857_v17 = vpop.f32.mrf.mxu1 }
  0xef   : > { %v394_v21 = vpop.f32.mrf.mxu0  ;;  %v475_v23 = vadd.f32 %v857_v17, %v822_v16 }
  0xf0   : > { %v469_v22 = vpop.f32.mrf.mxu1 }
  0xf1   : > { %v470_v26 = vadd.f32 %v469_v22, %v394_v21 }
 0x10e   : > { %v892_v25 = vpop.f32.mrf.mxu0 }
 0x10f   : > { %v571_v27 = vadd.f32 %v892_v25, %v475_v23 }
 0x110   : > { %v561_v29 = vpop.f32.mrf.mxu0 }
 0x111   : > { %v579_v30 = vmul.f32 %v576_v24, %v571_v27  ;;  %v570_v31 = vadd.f32 %v561_v29, %v470_v26 }
 0x113   : > { %v587_v32 = vadd.f32 %v584_v28, %v579_v30  ;;  %v578_v33 = vmul.f32 %v576_v24, %v570_v31 }
 0x115   : > { %v591_v34 = vmin.f32 %v587_v32, 0.0  ;;  %v586_v35 = vadd.f32 %v584_v28, %v578_v33  ;;  %vm589_vm2 = vcmp.gt.f32.partialorder %v587_v32, 0.0 }
 0x117   : > { %v594_v36 = vmul.f32 1.442695, %v591_v34  ;;  %v590_v37 = vmin.f32 %v586_v35, 0.0  ;;  %vm588_vm3 = vcmp.gt.f32.partialorder %v586_v35, 0.0 }
 0x119   : > { %903 = vpow2.f32 %v594_v36  ;;  %v592_v38 = vmul.f32 1.442695, %v590_v37 }
 0x11b   : > { %905 = vpow2.f32 %v592_v38 }
 0x126   : > { %v904_v39 = vpop.eup %903 }
 0x127   : > { %v729_v40 = vadd.f32 -1.0, %v904_v39 }
 0x128   : > { %v906_v41 = vpop.eup %905 }
 0x129   : > { %v599_v42 = vsel %vm589_vm2, %v587_v32, %v729_v40  ;;  %v728_v43 = vadd.f32 -1.0, %v906_v41 }
 0x12a   : > { %v603_v45 = vrot.slane %v599_v42, 7  ;;  %v610_v48 = vrot.slane %v599_v42, 1 }
 0x12b   : > { %v598_v44 = vsel %vm588_vm3, %v586_v35, %v728_v43 }
 0x12c   : > { %v602_v46 = vrot.slane %v598_v44, 7  ;;  %v609_v47 = vrot.slane %v598_v44, 1  ;;  %v623_v54 = vrot.slane %v598_v44, 2 }
 0x12e   : > { %v604_v49 = vsel %vm254_vm0, %v602_v46, %v603_v45  ;;  %v607_v50 = vsel %vm254_vm0, -inf, %v602_v46  ;;  %v622_v53 = vmax.f32 %v599_v42, %v609_v47  ;;  %v611_v55 = vsel %vm608_vm4, %v609_v47, %v610_v48 }
 0x12f   : > { %v616_v51 = vmax.f32 %v607_v50, %v598_v44  ;;  %v617_v52 = vmax.f32 %v604_v49, %v599_v42  ;;  %v615_v56 = vsel %vm608_vm4, %v610_v48, %v609_v47 }
 0x130   : > { %v625_v59 = vmax.f32 %v622_v53, %v623_v54 }
 0x131   : > { %v618_v57 = vmax.f32 %v616_v51, %v611_v55  ;;  %v619_v58 = vmax.f32 %v617_v52, %v615_v56 }
 0x132   : > { %626 = vst [vmem:[#allocation2 + $0x9] sm:$0x80] %v625_v59 }
 0x133   : > { %620 = vst [vmem:[#allocation2] sm:$0xff] %v618_v57  ;;  %621 = vst [vmem:[#allocation2 + $0x8] sm:$0xff] %v619_v58 }
 0x139   : > { %v629_v61 = vld [vmem:[#allocation2 + $0x10] ss:$2 sm:$0x1] }
 0x13a   : > { %v627_v60 = vld [vmem:[#allocation2] ss:$2 sm:$0xff]  ;;  %631 = vst [vmem:[%s251_s30 + $0x8] sm:$0x1] %v629_v61 }
 0x13b   : > { %630 = vst [vmem:[%s251_s30] sm:$0xff] %v627_v60 }
 0x13c PF: > { %s16_s21 = sadd.s32 1, %s913_s21  }
 0x13d   : > { %p13_p4 = scmp.ge.s32.totalorder %s16_s21, 4  }
 0x13f   :  { %15 = sbr.rel (!%p13_p4) target bundleno = 1 (0x1), region = 77 }

</bundles_post_ra>
